<compile_context>
chip_gen: v7x
topology: tpu7x:2x2x1
jax: 0.10.0
libtpu: 0.0.40
codegen_flags: <defaults>
</compile_context>

<pallas_src>
import jax
import jax.numpy as jnp
from jax.experimental import pallas as pl
from jax.experimental.pallas import tpu as pltpu

B = 4           # batch
D1 = 1          # x1 features
D2 = 3          # x2 features
H = 32          # hidden width of w1 / size of p1..p4
K = 16          # width of w2 / output width of w3
PAD = 8         # padded contraction width: [x1 | 1 | x2 | zeros] -> 8 columns


def model_kernel(aug_ref, c_ref, out_ref):
    """Single-MXU-matmul kernel.

    aug_ref : (B, PAD)  = [x1, ones, x2, zero-pad]
    c_ref   : (PAD, K)  = [fused_row; b_eff; p2*W2.T (D2 rows); zero-pad]
    out     : (B, K)    = aug @ C
    """
    out_ref[...] = jnp.dot(
        aug_ref[...], c_ref[...], preferred_element_type=jnp.float32
    ).astype(out_ref.dtype)


def fold_params(params):
    """Host-side constant folding. Run ONCE per parameter set.

    Returns a packed (PAD, K) constant slab whose rows are:
      row 0        : fused_row = W1.T @ (W3.T + p4[:,None])
      row 1        : b_eff     = p1@W3.T + b3 + b1@(W3.T + p4[:,None]) + p2*b2
      rows 2..4    : W2t_eff   = p2 * W2.T
      rows 5..7    : zeros (contraction padding)
    """
    hp = jax.lax.Precision.HIGHEST
    W1t = params["W1"].T                                   # (D1, H)
    W2t = params["W2"].T                                   # (D2, K)
    W3t = params["W3"].T                                   # (H, K)
    p2 = params["p2"][0]

    W3t_eff = W3t + params["p4"][:, None]                  # (H, K)
    fused_row = jnp.dot(W1t, W3t_eff, precision=hp)        # (1, K)
    W2t_eff = p2 * W2t                                     # (D2, K)
    b_eff = (jnp.dot(params["p1"], W3t, precision=hp)
             + params["b3"]
             + jnp.dot(params["b1"], W3t_eff, precision=hp)
             + p2 * params["b2"]).reshape(1, K)            # (1, K)

    zpad = jnp.zeros((PAD - 2 - D2, K), jnp.float32)
    return jnp.concatenate([fused_row, b_eff, W2t_eff, zpad], axis=0)  # (PAD, K)


def _augment(x1, x2):
    """[x1 | ones | x2 | zeros] -> (B, PAD). Fuses into the jitted trace."""
    b = x1.shape[0]
    ones = jnp.ones((b, 1), jnp.float32)
    zpad = jnp.zeros((b, PAD - 1 - D1 - D2), jnp.float32)
    return jnp.concatenate([x1, ones, x2, zpad], axis=1)


@jax.jit
def model_forward(x1, x2, const):
    aug = _augment(x1, x2)
    vmem = pl.BlockSpec(memory_space=pltpu.MemorySpace.VMEM)
    return pl.pallas_call(
        model_kernel,
        out_shape=jax.ShapeDtypeStruct((B, K), jnp.float32),
        in_specs=[vmem, vmem],
        out_specs=vmem,
    )(aug, const)


def model_reference(x1, x2, params):
    """Pure-JAX reference of the same (shape-fixed) forward, unfolded."""
    hp = jax.lax.Precision.HIGHEST
    a1 = jnp.dot(x1, params["W1"].T, precision=hp) + params["b1"]
    a2 = jnp.dot(x2, params["W2"].T, precision=hp) + params["b2"]
    t3 = (jnp.dot(a1 + params["p1"], params["W3"].T, precision=hp)
          + params["b3"] + params["p2"][0] * a2)
    t4 = jnp.dot(a1, params["p4"][:, None], precision=hp)
    return t3 + t4


def init_params(key):
    ks = jax.random.split(key, 10)
    return {
        "p1": jax.random.normal(ks[0], (H,), jnp.float32),
        "p2": jax.random.normal(ks[1], (1,), jnp.float32),
        "p3": jax.random.normal(ks[2], (H,), jnp.float32),   # unused (as in original)
        "p4": jax.random.normal(ks[3], (H,), jnp.float32),
        "W1": jax.random.normal(ks[4], (H, D1), jnp.float32) * 0.5,
        "b1": jax.random.normal(ks[5], (H,), jnp.float32) * 0.1,
        "W2": jax.random.normal(ks[6], (K, D2), jnp.float32) * 0.5,
        "b2": jax.random.normal(ks[7], (K,), jnp.float32) * 0.1,
        "W3": jax.random.normal(ks[8], (K, H), jnp.float32) * 0.2,
        "b3": jax.random.normal(ks[9], (K,), jnp.float32) * 0.1,
    }


if __name__ == "__main__":
    key = jax.random.PRNGKey(0)
    k1, k2, kp = jax.random.split(key, 3)
    x1 = jax.random.normal(k1, (B, D1), jnp.float32)
    x2 = jax.random.normal(k2, (B, D2), jnp.float32)
    params = init_params(kp)

    # Parameter folding done exactly once, outside the forward pass.
    const = jax.block_until_ready(fold_params(params))

    out = model_forward(x1, x2, const)
    out = jax.block_until_ready(out)

    ref = model_reference(x1, x2, params)
    assert out.shape == (B, K)
    assert jnp.allclose(out, ref, atol=1e-4, rtol=1e-4), "mismatch vs JAX reference"

    print("KERNEL_OK")
</pallas_src>

<mosaic_0001>
module attributes {stable_mosaic.version = 11 : i64} {
  func.func @model_kernel(%arg0: memref<4x8xf32, #tpu.memory_space<vmem>>, %arg1: memref<8x16xf32, #tpu.memory_space<vmem>>, %arg2: memref<4x16xf32, #tpu.memory_space<vmem>>) attributes {dimension_semantics = [], scalar_prefetch = 0 : i64, scratch_operands = 0 : i64, tpu.core_type = #tpu.core_type<tc>} {
    %c0 = arith.constant 0 : index
    %c0_0 = arith.constant 0 : index
    %0 = vector.load %arg0[%c0, %c0_0] : memref<4x8xf32, #tpu.memory_space<vmem>>, vector<4x8xf32>
    %c0_1 = arith.constant 0 : index
    %c0_2 = arith.constant 0 : index
    %1 = vector.load %arg1[%c0_1, %c0_2] : memref<8x16xf32, #tpu.memory_space<vmem>>, vector<8x16xf32>
    %cst = arith.constant dense<0.000000e+00> : vector<4x16xf32>
    %2 = tpu.matmul %0, %1, %cst {dimension_numbers = #tpu.dot_dimension_numbers<[1], [0], [0], [1], [0, 0, 1, 1], [], []>} : vector<4x8xf32>, vector<8x16xf32>, vector<4x16xf32> -> vector<4x16xf32>
    %c0_3 = arith.constant 0 : index
    %c0_4 = arith.constant 0 : index
    %3 = vector.load %arg2[%c0_3, %c0_4] : memref<4x16xf32, #tpu.memory_space<vmem>>, vector<4x16xf32>
    tpu.vector_store %arg2[%c0_3, %c0_4], %2 {strides = array<i32>} : memref<4x16xf32, #tpu.memory_space<vmem>>, vector<4x16xf32>,
    return
  }
}

</mosaic_0001>

<bundles_post_ra>
// kernel: model_forward.1
= control target key start
LH: loop header
LB: loop body
LE: loop exit
PB: predicated region body
PF: predicated region fallthrough
CT: control target
= control target key end

     0   :  { %vm14_vm0 = vcmask 64512   ;;  %v139_v2 = vmov 0.0   ;;  %vm140_vm1 = vmmov 0   ;;  %s175_s0 = inlined_call_operand.vmem [shape: f32[4,8], index: 0, kind: input, shape index: {}]   ;;  %s176_s1 = inlined_call_operand.vmem [shape: f32[8,16], index: 1, kind: input, shape index: {}]   ;;  %s177_s2 = inlined_call_operand.hbm [shape: f32[4,16], index: 2, kind: output, shape index: {}]  }
   0x1   :  { %v13_v0 = vld [vmem:[%s176_s1] sm:$0xff]  ;;  %107 = vmatprep.subr.mxu0 %v139_v2  ;;  %109 = vmatprep.mubr.msk.f32.mxu0 %vm140_vm1, %v139_v2 }
   0x2   :  { %v12_v1 = vld [vmem:[%s175_s0] sm:$0xf] }
   0x3   :  { %7 = vsyncpa [#allocation3], 0  ;;  %108 = vmatpush3.msra.mxu0 %v13_v0  ;;  %s141_s13 = smov [#allocation2]   ;;  %vm88_vm2 = vcmask 125952  }
   0x4   :  { %110 = vmatmul.mubr.msk.f32.vlgmr.msra.gmra.mrb[0].mxu0 %vm14_vm0, %v12_v1  ;;  %s96_s14 = sshll.u32 %s141_s13, 4  ;;  %s97_s14 = int_to_ptr.vmem [resolvable:$true] %s96_s14 }
   0x5   :  { %s115_s1 = scalar_lea.vmem %s97_s14, 64  ;;  %p120_p1 = scmp.lt.s32.totalorder %s97_s14, %s97_s14 }
   0x6   :  { %p116_p0 = scmp.ne.s32.totalorder %s97_s14, %s115_s1  ;;  %p121_p2 = scmp.lt.s32.totalorder %s115_s1, %s115_s1 }
   0x8   :  { %p122_p3 = por %p121_p2, %p120_p1 }
   0xa   :  { %p123_p4 = pnand %p122_p3, %p116_p0 }
  0xd7   :  { %v84_v3 = vpop.f32.mrb[0].mxu0 }
  0xd8   :  { %89 = vst.msk [vmem:[#allocation2] sm:$0xf] %vm88_vm2, %v84_v3  ;;  %v111_v4 = vpop.f32.mrb[1].mxu0 }
  0xd9   :  { %126 = shalt.err (!%p123_p4)
}
  0xda   :  { %s127_s16 = scalar_lea.hbm %s177_s2, 64 }
  0xdb   :  { %p128_p5 = scmp.ne.s32.totalorder %s177_s2, %s127_s16  ;;  %p131_p6 = scmp.lt.u32.totalorder %s127_s16, %s177_s2 }
  0xdd   :  { %p133_p7 = pnand %p131_p6, %p128_p5 }
  0xdf   :  { %136 = shalt.err (!%p133_p7)
}
  0xe0   :  { %99 = dma.vmem_to_hbm [thread:$0]  %s97_s14, 64, %s177_s2, [#allocation3]  }
  0xe1   :  { %137 = dma.done.wait [#allocation3], 64  }
  0xe2   :  { %138 = vsyncadd [#allocation3], 4294967232 }
  0xe3   :  { %103 = vsyncpa [#allocation3], 1 }

</bundles_post_ra>
